<compile_context>
chip_gen: v7x
topology: tpu7x:2x2x1
jax: 0.10.0
libtpu: 0.0.40
codegen_flags: <defaults>
</compile_context>

<pallas_src>
from functools import partial

import jax
import jax.numpy as jnp
from jax.experimental import pallas as pl
from jax.experimental.pallas import tpu as pltpu


def _s2d_kernel(x_ref, s_ref, o_ref, *, bd, bh, bw):
    """One grid step: `tc` channels x one output-depth slice.

    x_ref: (tc, bd*Hb, bh*W)    rows r = doff*Hb + h', cols j = hoff*W + w
    s_ref: (bh*bw, bh*W, Wb)    0/1 selection matrices, k = hoff*bw + woff
    o_ref: (bd*bh*bw, tc, Hb, Wb)
    """
    tc, rows, lanes = x_ref.shape          # rows = bd*Hb, lanes = bh*W
    hb = rows // bd                        # Hb
    wb = s_ref.shape[2]                    # Wb
    k2 = bh * bw

    if rows % 8 == 0:
        # Sublane-aligned: folding channels into the matmul row dim is a
        # layout-free reshape -> k2 big matmuls per grid step.
        t = x_ref[...].reshape(tc * rows, lanes)
        for k in range(k2):                # k = hoff*bw + woff (static unroll)
            y = jnp.dot(t, s_ref[k],
                        preferred_element_type=jnp.float32,
                        precision=jax.lax.Precision.HIGHEST)   # (tc*rows, Wb)
            y = y.reshape(tc, rows, wb)
            for doff in range(bd):
                o_ref[doff * k2 + k] = (
                    y[:, doff * hb:(doff + 1) * hb, :].astype(o_ref.dtype))
    else:
        # Fallback: per-channel 2-D matmuls (no in-register row merge needed).
        for ci in range(tc):
            t = x_ref[ci]                  # (rows, lanes)
            for k in range(k2):
                y = jnp.dot(t, s_ref[k],
                            preferred_element_type=jnp.float32,
                            precision=jax.lax.Precision.HIGHEST)  # (rows, Wb)
                for doff in range(bd):
                    o_ref[doff * k2 + k, ci] = (
                        y[doff * hb:(doff + 1) * hb].astype(o_ref.dtype))


def _pick_tc(C, per_channel_bytes, merge_ok, target_bytes=1 << 20, max_unroll=8):
    """Largest divisor of C that keeps the input block near `target_bytes`.

    When the merged-row path is unavailable (per-channel unroll), also bound
    the static unroll factor.
    """
    cap = max(1, target_bytes // max(1, per_channel_bytes))
    if not merge_ok:
        cap = min(cap, max_unroll)
    tc = int(min(C, cap))
    tc = max(tc, 1)
    while C % tc:
        tc -= 1
    return tc


def space_to_depth(x, block_size=(2, 2, 2), tc=None):
    bd, bh, bw = block_size
    N, C, D, H, W = x.shape
    assert D % bd == 0 and H % bh == 0 and W % bw == 0, \
        "spatial dims must be divisible by block_size"
    Db, Hb, Wb = D // bd, H // bh, W // bw
    K = bd * bh * bw       # channel expansion factor
    K2 = bh * bw           # number of selection matrices

    itemsize = x.dtype.itemsize
    merge_ok = (bd * Hb) % 8 == 0
    if tc is None:
        tc = _pick_tc(C, bd * H * W * itemsize, merge_ok)
    assert C % tc == 0

    # Free (bitcast) reshape: per (n, c, d') a 2-D tile whose
    # rows are r = doff*Hb + h' and cols are j = hoff*W + w.
    xv = x.reshape(N, C, Db, bd * Hb, bh * W)

    # 0/1 selection matrices: S[k, j, q] = 1 iff j == hoff*W + q*bw + woff,
    # with k = hoff*bw + woff.  Right-multiplying by S[k] performs the whole
    # (hoff, woff) de-interleave on the MXU.
    j = jnp.arange(bh * W)
    q = jnp.arange(Wb)
    mats = []
    for hoff in range(bh):
        for woff in range(bw):
            tgt = hoff * W + q * bw + woff
            mats.append((j[:, None] == tgt[None, :]).astype(x.dtype))
    S = jnp.stack(mats, axis=0)                    # (K2, bh*W, Wb)

    out_elems = N * K * C * Db * Hb * Wb
    cost = pl.CostEstimate(
        flops=int(2 * N * C * Db * K2 * (bd * Hb) * (bh * W) * Wb),
        transcendentals=0,
        bytes_accessed=int(x.size) * itemsize + out_elems * itemsize
                       + int(S.size) * itemsize,
    )

    out6 = pl.pallas_call(
        partial(_s2d_kernel, bd=bd, bh=bh, bw=bw),
        out_shape=jax.ShapeDtypeStruct((N, K, C, Db, Hb, Wb), x.dtype),
        grid_spec=pltpu.PrefetchScalarGridSpec(
            num_scalar_prefetch=0,
            grid=(N, C // tc, Db),
            in_specs=[
                # tc channels x (both input depth slices of one output depth):
                # a fully contiguous bd*H*W run per channel.
                pl.BlockSpec((None, tc, None, bd * Hb, bh * W),
                             lambda n, cb, db: (n, cb, db, 0, 0)),
                # selection matrices: tiny, resident (constant block index).
                pl.BlockSpec((K2, bh * W, Wb),
                             lambda n, cb, db: (0, 0, 0)),
            ],
            out_specs=pl.BlockSpec((None, K, tc, None, Hb, Wb),
                                   lambda n, cb, db: (n, 0, cb, db, 0, 0)),
        ),
        compiler_params=pltpu.CompilerParams(
            dimension_semantics=("parallel", "parallel", "parallel"),
            vmem_limit_bytes=32 * 1024 * 1024),
        cost_estimate=cost,
    )(xv, S)

    # Free merge of (K, C): output channel = k*C + c, matching the PyTorch
    # permute(0, 3, 5, 7, 1, 2, 4, 6) + view ordering.
    return out6.reshape(N, K * C, Db, Hb, Wb)


def space_to_depth_ref(x, block_size=(2, 2, 2)):
    """Plain-JAX reference mirroring the PyTorch forward."""
    bd, bh, bw = block_size
    N, C, D, H, W = x.shape
    y = x.reshape(N, C, D // bd, bd, H // bh, bh, W // bw, bw)
    y = jnp.transpose(y, (0, 3, 5, 7, 1, 2, 4, 6))
    return y.reshape(N, C * bd * bh * bw, D // bd, H // bh, W // bw)


if __name__ == "__main__":
    key = jax.random.PRNGKey(0)
    N, C, D, H, W = 2, 8, 4, 8, 16

    x = jax.random.normal(key, (N, C, D, H, W), dtype=jnp.float32)
    # Snap values to bf16-representable f32 so the 0/1 selection-matmul check is
    # exact regardless of how many MXU passes the f32 dot uses.
    x = x.astype(jnp.bfloat16).astype(jnp.float32)

    out = jax.block_until_ready(space_to_depth(x))
    ref = space_to_depth_ref(x)

    assert out.shape == (N, C * 8, D // 2, H // 2, W // 2), out.shape
    err = float(jnp.max(jnp.abs(out - ref)))
    assert jnp.allclose(out, ref, atol=1e-6, rtol=1e-6), f"max abs err {err}"
    print("KERNEL_OK")
</pallas_src>

<mosaic_0001>
module attributes {stable_mosaic.version = 11 : i64} {
  func.func @_s2d_kernel(%arg0: i32, %arg1: i32, %arg2: i32, %arg3: memref<1x8x1x8x32xf32, #tpu.memory_space<vmem>>, %arg4: memref<4x32x8xf32, #tpu.memory_space<vmem>>, %arg5: memref<1x8x8x1x4x8xf32, #tpu.memory_space<vmem>>) attributes {dimension_semantics = [#tpu.dimension_semantics<parallel>, #tpu.dimension_semantics<parallel>, #tpu.dimension_semantics<parallel>], iteration_bounds = array<i64: 2, 1, 2>, scalar_prefetch = 0 : i64, scratch_operands = 0 : i64, tpu.core_type = #tpu.core_type<tc>, window_params = [{transform_indices = @transform_0, window_bounds = array<i64: 1, 8, 1, 8, 32>}, {pipeline_mode = #tpu.pipeline_mode<synchronous>, transform_indices = @transform_1, window_bounds = array<i64: 4, 32, 8>}, {transform_indices = @transform_2, window_bounds = array<i64: 1, 8, 8, 1, 4, 8>}]} {
    %c0 = arith.constant 0 : index
    %c0_0 = arith.constant 0 : index
    %c0_1 = arith.constant 0 : index
    %c0_2 = arith.constant 0 : index
    %c0_3 = arith.constant 0 : index
    %0 = vector.load %arg3[%c0, %c0_0, %c0_1, %c0_2, %c0_3] : memref<1x8x1x8x32xf32, #tpu.memory_space<vmem>>, vector<1x8x1x8x32xf32>
    %1 = vector.shape_cast %0 : vector<1x8x1x8x32xf32> to vector<8x8x32xf32>
    %2 = vector.shape_cast %1 : vector<8x8x32xf32> to vector<64x32xf32>
    %c0_4 = arith.constant 0 : index
    %c0_5 = arith.constant 0 : index
    %c0_6 = arith.constant 0 : index
    %3 = vector.load %arg4[%c0_4, %c0_5, %c0_6] : memref<4x32x8xf32, #tpu.memory_space<vmem>>, vector<1x32x8xf32>
    %4 = vector.shape_cast %3 : vector<1x32x8xf32> to vector<32x8xf32>
    %cst = arith.constant dense<0.000000e+00> : vector<64x8xf32>
    %5 = tpu.matmul %2, %4, %cst {dimension_numbers = #tpu.dot_dimension_numbers<[1], [0], [0], [1], [0, 0, 1, 1], [], []>, precision = #tpu.contract_precision<fp32>} : vector<64x32xf32>, vector<32x8xf32>, vector<64x8xf32> -> vector<64x8xf32>
    %6 = vector.shape_cast %5 : vector<64x8xf32> to vector<8x8x8xf32>
    %7 = vector.extract_strided_slice %6 {offsets = [0, 0, 0], sizes = [8, 4, 8], strides = [1, 1, 1]} : vector<8x8x8xf32> to vector<8x4x8xf32>
    %c0_7 = arith.constant 0 : index
    %c0_8 = arith.constant 0 : index
    %c0_9 = arith.constant 0 : index
    %c0_10 = arith.constant 0 : index
    %c0_11 = arith.constant 0 : index
    %c0_12 = arith.constant 0 : index
    %8 = vector.load %arg5[%c0_7, %c0_8, %c0_9, %c0_10, %c0_11, %c0_12] : memref<1x8x8x1x4x8xf32, #tpu.memory_space<vmem>>, vector<1x1x8x1x4x8xf32>
    %9 = vector.shape_cast %8 : vector<1x1x8x1x4x8xf32> to vector<8x4x8xf32>
    %10 = vector.shape_cast %7 : vector<8x4x8xf32> to vector<1x1x8x1x4x8xf32>
    tpu.vector_store %arg5[%c0_7, %c0_8, %c0_9, %c0_10, %c0_11, %c0_12], %10 {strides = array<i32>} : memref<1x8x8x1x4x8xf32, #tpu.memory_space<vmem>>, vector<1x1x8x1x4x8xf32>,
    %11 = vector.extract_strided_slice %6 {offsets = [0, 4, 0], sizes = [8, 4, 8], strides = [1, 1, 1]} : vector<8x8x8xf32> to vector<8x4x8xf32>
    %c0_13 = arith.constant 0 : index
    %c4 = arith.constant 4 : index
    %c0_14 = arith.constant 0 : index
    %c0_15 = arith.constant 0 : index
    %c0_16 = arith.constant 0 : index
    %c0_17 = arith.constant 0 : index
    %12 = vector.load %arg5[%c0_13, %c4, %c0_14, %c0_15, %c0_16, %c0_17] : memref<1x8x8x1x4x8xf32, #tpu.memory_space<vmem>>, vector<1x1x8x1x4x8xf32>
    %13 = vector.shape_cast %12 : vector<1x1x8x1x4x8xf32> to vector<8x4x8xf32>
    %14 = vector.shape_cast %11 : vector<8x4x8xf32> to vector<1x1x8x1x4x8xf32>
    tpu.vector_store %arg5[%c0_13, %c4, %c0_14, %c0_15, %c0_16, %c0_17], %14 {strides = array<i32>} : memref<1x8x8x1x4x8xf32, #tpu.memory_space<vmem>>, vector<1x1x8x1x4x8xf32>,
    %c1 = arith.constant 1 : index
    %c0_18 = arith.constant 0 : index
    %c0_19 = arith.constant 0 : index
    %15 = vector.load %arg4[%c1, %c0_18, %c0_19] : memref<4x32x8xf32, #tpu.memory_space<vmem>>, vector<1x32x8xf32>
    %16 = vector.shape_cast %15 : vector<1x32x8xf32> to vector<32x8xf32>
    %cst_20 = arith.constant dense<0.000000e+00> : vector<64x8xf32>
    %17 = tpu.matmul %2, %16, %cst_20 {dimension_numbers = #tpu.dot_dimension_numbers<[1], [0], [0], [1], [0, 0, 1, 1], [], []>, precision = #tpu.contract_precision<fp32>} : vector<64x32xf32>, vector<32x8xf32>, vector<64x8xf32> -> vector<64x8xf32>
    %18 = vector.shape_cast %17 : vector<64x8xf32> to vector<8x8x8xf32>
    %19 = vector.extract_strided_slice %18 {offsets = [0, 0, 0], sizes = [8, 4, 8], strides = [1, 1, 1]} : vector<8x8x8xf32> to vector<8x4x8xf32>
    %c0_21 = arith.constant 0 : index
    %c1_22 = arith.constant 1 : index
    %c0_23 = arith.constant 0 : index
    %c0_24 = arith.constant 0 : index
    %c0_25 = arith.constant 0 : index
    %c0_26 = arith.constant 0 : index
    %20 = vector.load %arg5[%c0_21, %c1_22, %c0_23, %c0_24, %c0_25, %c0_26] : memref<1x8x8x1x4x8xf32, #tpu.memory_space<vmem>>, vector<1x1x8x1x4x8xf32>
    %21 = vector.shape_cast %20 : vector<1x1x8x1x4x8xf32> to vector<8x4x8xf32>
    %22 = vector.shape_cast %19 : vector<8x4x8xf32> to vector<1x1x8x1x4x8xf32>
    tpu.vector_store %arg5[%c0_21, %c1_22, %c0_23, %c0_24, %c0_25, %c0_26], %22 {strides = array<i32>} : memref<1x8x8x1x4x8xf32, #tpu.memory_space<vmem>>, vector<1x1x8x1x4x8xf32>,
    %23 = vector.extract_strided_slice %18 {offsets = [0, 4, 0], sizes = [8, 4, 8], strides = [1, 1, 1]} : vector<8x8x8xf32> to vector<8x4x8xf32>
    %c0_27 = arith.constant 0 : index
    %c5 = arith.constant 5 : index
    %c0_28 = arith.constant 0 : index
    %c0_29 = arith.constant 0 : index
    %c0_30 = arith.constant 0 : index
    %c0_31 = arith.constant 0 : index
    %24 = vector.load %arg5[%c0_27, %c5, %c0_28, %c0_29, %c0_30, %c0_31] : memref<1x8x8x1x4x8xf32, #tpu.memory_space<vmem>>, vector<1x1x8x1x4x8xf32>
    %25 = vector.shape_cast %24 : vector<1x1x8x1x4x8xf32> to vector<8x4x8xf32>
    %26 = vector.shape_cast %23 : vector<8x4x8xf32> to vector<1x1x8x1x4x8xf32>
    tpu.vector_store %arg5[%c0_27, %c5, %c0_28, %c0_29, %c0_30, %c0_31], %26 {strides = array<i32>} : memref<1x8x8x1x4x8xf32, #tpu.memory_space<vmem>>, vector<1x1x8x1x4x8xf32>,
    %c2 = arith.constant 2 : index
    %c0_32 = arith.constant 0 : index
    %c0_33 = arith.constant 0 : index
    %27 = vector.load %arg4[%c2, %c0_32, %c0_33] : memref<4x32x8xf32, #tpu.memory_space<vmem>>, vector<1x32x8xf32>
    %28 = vector.shape_cast %27 : vector<1x32x8xf32> to vector<32x8xf32>
    %cst_34 = arith.constant dense<0.000000e+00> : vector<64x8xf32>
    %29 = tpu.matmul %2, %28, %cst_34 {dimension_numbers = #tpu.dot_dimension_numbers<[1], [0], [0], [1], [0, 0, 1, 1], [], []>, precision = #tpu.contract_precision<fp32>} : vector<64x32xf32>, vector<32x8xf32>, vector<64x8xf32> -> vector<64x8xf32>
    %30 = vector.shape_cast %29 : vector<64x8xf32> to vector<8x8x8xf32>
    %31 = vector.extract_strided_slice %30 {offsets = [0, 0, 0], sizes = [8, 4, 8], strides = [1, 1, 1]} : vector<8x8x8xf32> to vector<8x4x8xf32>
    %c0_35 = arith.constant 0 : index
    %c2_36 = arith.constant 2 : index
    %c0_37 = arith.constant 0 : index
    %c0_38 = arith.constant 0 : index
    %c0_39 = arith.constant 0 : index
    %c0_40 = arith.constant 0 : index
    %32 = vector.load %arg5[%c0_35, %c2_36, %c0_37, %c0_38, %c0_39, %c0_40] : memref<1x8x8x1x4x8xf32, #tpu.memory_space<vmem>>, vector<1x1x8x1x4x8xf32>
    %33 = vector.shape_cast %32 : vector<1x1x8x1x4x8xf32> to vector<8x4x8xf32>
    %34 = vector.shape_cast %31 : vector<8x4x8xf32> to vector<1x1x8x1x4x8xf32>
    tpu.vector_store %arg5[%c0_35, %c2_36, %c0_37, %c0_38, %c0_39, %c0_40], %34 {strides = array<i32>} : memref<1x8x8x1x4x8xf32, #tpu.memory_space<vmem>>, vector<1x1x8x1x4x8xf32>,
    %35 = vector.extract_strided_slice %30 {offsets = [0, 4, 0], sizes = [8, 4, 8], strides = [1, 1, 1]} : vector<8x8x8xf32> to vector<8x4x8xf32>
    %c0_41 = arith.constant 0 : index
    %c6 = arith.constant 6 : index
    %c0_42 = arith.constant 0 : index
    %c0_43 = arith.constant 0 : index
    %c0_44 = arith.constant 0 : index
    %c0_45 = arith.constant 0 : index
    %36 = vector.load %arg5[%c0_41, %c6, %c0_42, %c0_43, %c0_44, %c0_45] : memref<1x8x8x1x4x8xf32, #tpu.memory_space<vmem>>, vector<1x1x8x1x4x8xf32>
    %37 = vector.shape_cast %36 : vector<1x1x8x1x4x8xf32> to vector<8x4x8xf32>
    %38 = vector.shape_cast %35 : vector<8x4x8xf32> to vector<1x1x8x1x4x8xf32>
    tpu.vector_store %arg5[%c0_41, %c6, %c0_42, %c0_43, %c0_44, %c0_45], %38 {strides = array<i32>} : memref<1x8x8x1x4x8xf32, #tpu.memory_space<vmem>>, vector<1x1x8x1x4x8xf32>,
    %c3 = arith.constant 3 : index
    %c0_46 = arith.constant 0 : index
    %c0_47 = arith.constant 0 : index
    %39 = vector.load %arg4[%c3, %c0_46, %c0_47] : memref<4x32x8xf32, #tpu.memory_space<vmem>>, vector<1x32x8xf32>
    %40 = vector.shape_cast %39 : vector<1x32x8xf32> to vector<32x8xf32>
    %cst_48 = arith.constant dense<0.000000e+00> : vector<64x8xf32>
    %41 = tpu.matmul %2, %40, %cst_48 {dimension_numbers = #tpu.dot_dimension_numbers<[1], [0], [0], [1], [0, 0, 1, 1], [], []>, precision = #tpu.contract_precision<fp32>} : vector<64x32xf32>, vector<32x8xf32>, vector<64x8xf32> -> vector<64x8xf32>
    %42 = vector.shape_cast %41 : vector<64x8xf32> to vector<8x8x8xf32>
    %43 = vector.extract_strided_slice %42 {offsets = [0, 0, 0], sizes = [8, 4, 8], strides = [1, 1, 1]} : vector<8x8x8xf32> to vector<8x4x8xf32>
    %c0_49 = arith.constant 0 : index
    %c3_50 = arith.constant 3 : index
    %c0_51 = arith.constant 0 : index
    %c0_52 = arith.constant 0 : index
    %c0_53 = arith.constant 0 : index
    %c0_54 = arith.constant 0 : index
    %44 = vector.load %arg5[%c0_49, %c3_50, %c0_51, %c0_52, %c0_53, %c0_54] : memref<1x8x8x1x4x8xf32, #tpu.memory_space<vmem>>, vector<1x1x8x1x4x8xf32>
    %45 = vector.shape_cast %44 : vector<1x1x8x1x4x8xf32> to vector<8x4x8xf32>
    %46 = vector.shape_cast %43 : vector<8x4x8xf32> to vector<1x1x8x1x4x8xf32>
    tpu.vector_store %arg5[%c0_49, %c3_50, %c0_51, %c0_52, %c0_53, %c0_54], %46 {strides = array<i32>} : memref<1x8x8x1x4x8xf32, #tpu.memory_space<vmem>>, vector<1x1x8x1x4x8xf32>,
    %47 = vector.extract_strided_slice %42 {offsets = [0, 4, 0], sizes = [8, 4, 8], strides = [1, 1, 1]} : vector<8x8x8xf32> to vector<8x4x8xf32>
    %c0_55 = arith.constant 0 : index
    %c7 = arith.constant 7 : index
    %c0_56 = arith.constant 0 : index
    %c0_57 = arith.constant 0 : index
    %c0_58 = arith.constant 0 : index
    %c0_59 = arith.constant 0 : index
    %48 = vector.load %arg5[%c0_55, %c7, %c0_56, %c0_57, %c0_58, %c0_59] : memref<1x8x8x1x4x8xf32, #tpu.memory_space<vmem>>, vector<1x1x8x1x4x8xf32>
    %49 = vector.shape_cast %48 : vector<1x1x8x1x4x8xf32> to vector<8x4x8xf32>
    %50 = vector.shape_cast %47 : vector<8x4x8xf32> to vector<1x1x8x1x4x8xf32>
    tpu.vector_store %arg5[%c0_55, %c7, %c0_56, %c0_57, %c0_58, %c0_59], %50 {strides = array<i32>} : memref<1x8x8x1x4x8xf32, #tpu.memory_space<vmem>>, vector<1x1x8x1x4x8xf32>,
    return
  }
  func.func @transform_0(%arg0: i32, %arg1: i32, %arg2: i32) -> (i32, i32, i32, i32, i32) {
    %c0_i32 = arith.constant 0 : i32
    %c0_i32_0 = arith.constant 0 : i32
    %c0_i32_1 = arith.constant 0 : i32
    return %arg0, %arg1, %arg2, %c0_i32, %c0_i32_0 : i32, i32, i32, i32, i32
  }
  func.func @transform_1(%arg0: i32, %arg1: i32, %arg2: i32) -> (i32, i32, i32) {
    %c0_i32 = arith.constant 0 : i32
    %c0_i32_0 = arith.constant 0 : i32
    %c0_i32_1 = arith.constant 0 : i32
    %c0_i32_2 = arith.constant 0 : i32
    return %c0_i32, %c0_i32_0, %c0_i32_1 : i32, i32, i32
  }
  func.func @transform_2(%arg0: i32, %arg1: i32, %arg2: i32) -> (i32, i32, i32, i32, i32, i32) {
    %c0_i32 = arith.constant 0 : i32
    %c0_i32_0 = arith.constant 0 : i32
    %c0_i32_1 = arith.constant 0 : i32
    %c0_i32_2 = arith.constant 0 : i32
    return %arg0, %c0_i32, %arg1, %arg2, %c0_i32_0, %c0_i32_1 : i32, i32, i32, i32, i32, i32
  }
}

</mosaic_0001>

<bundles_post_ra>
// kernel: tpu_custom_call.1
= control target key start
LH: loop header
LB: loop body
LE: loop exit
PB: predicated region body
PF: predicated region fallthrough
CT: control target
= control target key end

     0   :  { %7 = vsyncpa [#allocation3], 0  ;;  %s5938_s0 = inlined_call_operand.hbm [shape: f32[2,8,2,8,32], index: 0, kind: input, shape index: {}]   ;;  %s5939_s1 = inlined_call_operand.vmem [shape: f32[4,32,8], index: 1, kind: input, shape index: {}]   ;;  %s5940_s2 = inlined_call_operand.hbm [shape: f32[2,8,8,2,4,8], index: 2, kind: output, shape index: {}]  }
   0x1   :  { %9 = vsyncpa [#allocation3 + $0x1], 0 }
   0x2   :  { %10 = vsyncpa [#allocation4], 0 }
   0x3   :  { %12 = vsyncpa [#allocation4 + $0x1], 0  ;;  %s5017_s9 = smov 0   ;;  %s5019_s10 = smov 0  }
   0x4   :  { %s5021_s11 = smov 0   ;;  %s5023_s12 = smov 0  }
   0x5   :  { %s5025_s13 = smov 0   ;;  %s5027_s14 = smov 0  }
   0x6   :  { %s5029_s15 = smov 0   ;;  %s5031_s16 = smov 0  }
   0x7 LB: > { %s3577_s17 = sadd.s32 4294967295, %s4992_s16   ;;  %s3578_s18 = sadd.s32 4294967294, %s4992_s16   ;;  %s4992_s16 = sphi %s5031_s16, %s18_s16   ;;  %s4988_s15 = sphi %s5029_s15, %s5955_s15   ;;  %s4984_s14 = sphi %s5027_s14, %s5954_s14   ;;  %s4980_s13 = sphi %s5025_s13, %s5953_s13   ;;  %s4976_s12 = sphi %s5023_s12, %s5952_s12   ;;  %s4972_s11 = sphi %s5021_s11, %s5951_s11   ;;  %s4968_s10 = sphi %s5019_s10, %s5950_s10   ;;  %s4964_s9 = sphi %s5017_s9, %s5949_s9  }
   0x8   : > { %s30_s19 = sadd.s32 1, %s4984_s14  ;;  %s37_s20 = sadd.s32 1, %s4988_s15 }
   0x9   : > { %p31_p0 = scmp.ge.s32.totalorder %s30_s19, 2  ;;  %s48_s21 = sadd.s32 1, %s4972_s11 }
   0xa   : > { %p55_p1 = scmp.ne.s32.totalorder %s4972_s11, %s4968_s10  ;;  %p56_p2 = scmp.eq.s32.totalorder %s4992_s16, 0 }
   0xb   : > { %s5957_s19 = smov (%p31_p0, %s30_s19), 0  ;;  %s5959_s20 = smov (!%p31_p0, %s37_s20), %s4988_s15 }
   0xc   : > { %s44_s22 = ssub.s32 %s4984_s14, %s5957_s19  ;;  %p5070_p3 = por %p56_p2, %p55_p1 }
   0xd   : > { %p39_p4 = scmp.ge.s32.totalorder %s5959_s20, 2  ;;  %p61_p5 = scmp.ne.s32.totalorder %s4968_s10, %s4964_s9 }
   0xe   : > { %p62_p6 = scmp.eq.s32.totalorder %s3577_s17, 0  ;;  %p110_p7 = scmp.eq.s32.totalorder %s3577_s17, 3 }
   0xf   : > { %s5961_s20 = smov (%p39_p4, %s5959_s20), 0  ;;  %p116_p10 = scmp.eq.s32.totalorder %s3578_s18, 3 }
  0x10   : > { %p5078_p8 = por %p62_p6, %p61_p5  ;;  %p5082_p9 = por %p110_p7, %p55_p1 }
  0x11   : > { %s41_s26 = ssub.s32 %s4988_s15, %s5961_s20  ;;  %p5088_p12 = por %p116_p10, %p61_p5 }
  0x12   : > { %s5944_s25 = scalar_select %p5082_p9, 1, 0 }
  0x13   : > { %s45_s27 = sor.u32 %s44_s22, %s41_s26  ;;  %p4792_p13 = scmp.lt.s32.totalorder %s4992_s16, 4 }
  0x14   : > { %p46_p11 = scmp.eq.s32.totalorder %s45_s27, 0  ;;  %s139_s29 = sand.u32 1, %s4972_s11  }
  0x15   : > { %s5945_s28 = scalar_select %p5088_p12, 1, 0 }
  0x16   : > { %s5095_s30 = scalar_select %p46_p11, %s4972_s11, %s48_s21  }
  0x17   : > { %s3581_s3 = sshll.u32 %s139_s29, 6  ;;  %s3582_s4 = sshll.u32 %s4988_s15, 4 }
  0x18   : > { %s151_s5 = sadd.s32 %s4984_s14, %s3582_s4  ;;  %s143_s6 = scalar_lea.vmem [#allocation2], %s3581_s3 }
  0x19   : > { %s154_s7 = sshll.u32 %s143_s6, 4  ;;  %s3583_s8 = sshll.u32 %s151_s5, 7  ;;  %s5099_s7 = int_to_ptr.vmem [resolvable:$true] %s154_s7 }
  0x1a   : > { %s5104_s22 = scalar_lea.hbm %s5938_s0, %s3583_s8  ;;  %p5108_p0 = pnand %p4792_p13, %p5070_p3 }
  0x1b   : > { %s5112_s26 = scalar_lea.sflag [#allocation3], %s139_s29  ;;  %s4864_s27 = scalar_lea.hbm %s5104_s22, 1024 }
  0x1c   : > { %p4865_p1 = scmp.ne.s32.totalorder %s5104_s22, %s4864_s27  ;;  %p4866_p2 = pneg %p5108_p0 }
  0x1d   : > { %s4869_s4 = scalar_lea.hbm %s5938_s0, 4096  ;;  %p4870_p3 = scmp.lt.u32.totalorder %s5104_s22, %s5938_s0 }
  0x1e   : > { %p4867_p4 = pnand %p4866_p2, %p4865_p1  ;;  %p4871_p6 = scmp.lt.u32.totalorder %s4869_s4, %s4864_s27 }
  0x1f   : > { %p4873_p10 = scmp.lt.u32.totalorder %s4864_s27, %s5104_s22 }
  0x20   : > { %p4868_p5 = pneg %p4867_p4  ;;  %p4872_p7 = por %p4871_p6, %p4870_p3 }
  0x22   : > { %p4874_p11 = por %p4873_p10, %p4872_p7 }
  0x24   : > { %p4875_p13 = pnand %p4874_p11, %p4868_p5 }
  0x26   : > { %4878 = shalt.err (!%p4875_p13)
}
  0x27   : > { %s4879_s29 = scalar_lea.vmem %s5099_s7, 1024  ;;  %s4994_s8 = smov [#allocation2]  }
  0x28   : > { %p4880_p1 = scmp.ne.s32.totalorder %s5099_s7, %s4879_s29  ;;  %s4884_s17 = sshll.u32 %s4994_s8, 4  ;;  %s4885_s17 = int_to_ptr.vmem [resolvable:$false] %s4884_s17 }
  0x29   : > { %s4886_s18 = scalar_lea.vmem %s4885_s17, 2048  ;;  %p4887_p9 = scmp.lt.s32.totalorder %s5099_s7, %s4885_s17 }
  0x2a   : > { %p4882_p4 = pnand %p4880_p1, %p4866_p2  ;;  %p4888_p3 = scmp.lt.s32.totalorder %s4886_s18, %s4879_s29 }
  0x2c   : > { %p4883_p12 = pneg %p4882_p4  ;;  %p4889_p6 = por %p4888_p3, %p4887_p9 }
  0x2e   : > { %p4890_p7 = pnand %p4889_p6, %p4883_p12 }
  0x30   : > { %4893 = shalt.err (!%p4890_p7)
}
  0x31   : > { %s4995_s27 = smov 256   ;;  %s4996_s23 = smov 128  }
  0x32   : > { %s4997_s3 = smov 8   ;;  %p3584_p2 = scmp.ge.s32.totalorder %s4992_s16, 1 }
  0x33   : > { %4787 = dma.hbm_to_vmem [thread:$0]  (!%p5108_p0), %s5104_s22, 1024, %s5099_s7, %s5112_s26, %s4995_s27, %s4996_s23, %s4997_s3  }
  0x34   : > { %p162_p5 = scmp.lt.s32.totalorder %s4992_s16, 5 }
  0x36   : > { %p163_p10 = pnand %p3584_p2, %p162_p5 }
  0x37   : > { %s5143_s4 = sand.u32 (!%p163_p10), 1, %s4968_s10  }
  0x38   : > { %166 = sbr.rel (%p163_p10) target bundleno = 503 (0x1f7), region = 28  ;;  %s3585_s5 = sshll.u32 (!%p163_p10), %s5143_s4, 6 }
  0x39   : > { %s169_s6 = scalar_lea.sflag (!%p163_p10), [#allocation3], %s5143_s4  ;;  %s5147_s29 = scalar_lea.vmem (!%p163_p10), [#allocation2], %s3585_s5 }
  0x3f   : > { %4955 = dma.done.wait (%p5078_p8), %s169_s6, 1024  }
  0x40   : > { %4957 = vsyncadd (%p5078_p8), %s169_s6, 4294966272  ;;  %v203_v0 = vld [vmem:[%s5939_s1] sm:$0xff]  ;;  %v204_v1 = vld [vmem:[%s5939_s1 + $0x8] sm:$0xff]  ;;  %vm207_vm0 = vcmask 261120   ;;  %s3586_s8 = sshll.u32 %s5143_s4, 8  ;;  %vm1018_vm1 = vcmask 60416  }
  0x41   : > { %v3595_v2 = vld [vmem:[%s5939_s1 + $0x20] sm:$0xff]  ;;  %v233_v3 = vand.u32 4294901760, %v203_v0  ;;  %v236_v4 = vand.u32 4294901760, %v204_v1  ;;  %v3596_v5 = vld [vmem:[%s5939_s1 + $0x28] sm:$0xff]  ;;  %v5168_v7 = vld [vmem:[%s5939_s1 + $0x10] sm:$0xff]  ;;  %vm1028_vm2 = vcmask 64516  }
  0x42   : > { %v1043_v6 = vand.u32 4294901760, %v3595_v2  ;;  %v5173_v8 = vld [vmem:[%s5939_s1 + $0x18] sm:$0xff]  ;;  %v1046_v9 = vand.u32 4294901760, %v3596_v5  ;;  %v239_v10 = vand.u32 4294901760, %v5168_v7  ;;  %v5180_v12 = vld [vmem:[%s5939_s1 + $0x30] sm:$0xff]  ;;  %v195_v14 = vld [vmem:[%s5147_s29] sm:$0xff] }
  0x43   : > { %v242_v11 = vand.u32 4294901760, %v5173_v8  ;;  %v5185_v13 = vld [vmem:[%s5939_s1 + $0x38] sm:$0xff]  ;;  %v5188_v15 = vpack.c.bf16 %v236_v4, %v233_v3  ;;  %v1049_v16 = vand.u32 4294901760, %v5180_v12  ;;  %v209_v18 = vsel %vm207_vm0, %v195_v14, 0  ;;  %v196_v19 = vld [vmem:[%s5147_s29 + $0x8] sm:$0xff]  ;;  %v197_v20 = vld [vmem:[%s5147_s29 + $0x10] sm:$0xff] }
  0x44   : > { %v1052_v17 = vand.u32 4294901760, %v5185_v13  ;;  %v5195_v21 = vpack.c.bf16 %v1046_v9, %v1043_v6  ;;  %v5203_v23 = vand.u32 4294901760, %v209_v18  ;;  %v212_v24 = vsel %vm207_vm0, %v196_v19, 0  ;;  %v198_v29 = vld [vmem:[%s5147_s29 + $0x18] sm:$0xff]  ;;  %v199_v50 = vld [vmem:[%s5147_s29 + $0x20] sm:$0xff]  ;;  %v200_v55 = vld [vmem:[%s5147_s29 + $0x28] sm:$0xff] }
  0x45   : > { %v5201_v22 = vpack.c.bf16 %v242_v11, %v239_v10  ;;  %4429 = vmatprep.subr.bf16.mxu0 %v5188_v15  ;;  %v5213_v26 = vand.u32 4294901760, %v212_v24  ;;  %v5215_v27 = vsub.f32 %v203_v0, %v233_v3  ;;  %v5217_v28 = vsub.f32 %v204_v1, %v236_v4  ;;  %v201_v0 = vld [vmem:[%s5147_s29 + $0x30] sm:$0xff]  ;;  %s5746_s17 = scalar_lea.vmem [#allocation5], %s3586_s8  ;;  %s3656_s18 = sshll.u32 %s4980_s13, 7 }
  0x46   : > { %v5211_v25 = vpack.c.bf16 %v1052_v17, %v1049_v16  ;;  %4477 = vmatprep.subr.bf16.mxu1 %v5195_v21  ;;  %4431 = vmatpush3.bf16.msra.mxu0 %v5188_v15  ;;  %v5223_v30 = vsub.f32 %v209_v18, %v5203_v23  ;;  %v5225_v31 = vsub.f32 %v3595_v2, %v1043_v6  ;;  %v215_v33 = vsel %vm207_vm0, %v197_v20, 0  ;;  %s3479_s24 = sadd.s32 %s4976_s12, %s3656_s18  ;;  %s3482_s13 = sshll.u32 %s5746_s17, 4  ;;  %s5868_s13 = int_to_ptr.vmem [resolvable:$true] %s3482_s13 }
  0x47   : > { %v5227_v32 = vsub.f32 %v3596_v5, %v1046_v9  ;;  %4479 = vmatpush3.bf16.msra.mxu1 %v5195_v21  ;;  %4433 = vmatprep.subr.bf16.mxu0 %v5201_v22  ;;  %v5233_v34 = vsub.f32 %v212_v24, %v5213_v26  ;;  %v384_v35 = vand.u32 4294901760, %v5215_v27  ;;  %v391_v36 = vand.u32 4294901760, %v5217_v28  ;;  %s3657_s12 = sshll.u32 %s3479_s24, 6  ;;  %s3465_s5 = scalar_lea.sflag [#allocation4], %s5143_s4 }
  0x48   : > { %v5237_v37 = vand.u32 4294901760, %v215_v33  ;;  %4481 = vmatprep.subr.bf16.mxu1 %v5211_v25  ;;  %v5241_v38 = vand.u32 4294901760, %v5223_v30  ;;  %v1194_v39 = vand.u32 4294901760, %v5225_v31  ;;  %v218_v41 = vsel %vm207_vm0, %v198_v29, 0  ;;  %v202_v29 = vld [vmem:[%s5147_s29 + $0x38] sm:$0xff]  ;;  %s5866_s3 = scalar_lea.hbm %s5940_s2, %s3657_s12  ;;  %s4894_s6 = scalar_lea.vmem %s5868_s13, 4096 }
  0x49   : > { %v1201_v40 = vand.u32 4294901760, %v5227_v32  ;;  %v5247_v42 = vand.u32 4294901760, %v5233_v34  ;;  %v385_v43 = vsub.f32 %v5215_v27, %v384_v35  ;;  %v392_v44 = vsub.f32 %v5217_v28, %v391_v36  ;;  %p4895_p8 = scmp.ne.s32.totalorder %s5868_s13, %s4894_s6  ;;  %p5947_p9 = scmp.ne.s32.totalorder %s5944_s25, 0 }
  0x4a   : > { %v5256_v45 = vsub.f32 %v215_v33, %v5237_v37  ;;  %4435 = vmatpush3.bf16.msra.mxu0 %v5201_v22  ;;  %v304_v46 = vsub.f32 %v5223_v30, %v5241_v38  ;;  %v1195_v47 = vsub.f32 %v5225_v31, %v1194_v39  ;;  %v5267_v49 = vand.u32 4294901760, %v218_v41  ;;  %s4998_s7 = smov [#allocation5]  }
  0x4b   : > { %v1202_v48 = vsub.f32 %v5227_v32, %v1201_v40  ;;  %4483 = vmatpush3.bf16.msra.mxu1 %v5211_v25  ;;  %v314_v51 = vsub.f32 %v5233_v34, %v5247_v42  ;;  %v386_v52 = vand.u32 4294901760, %v385_v43  ;;  %v393_v53 = vand.u32 4294901760, %v392_v44  ;;  %p4896_p12 = pnand %p4895_p8, %p5947_p9  ;;  %s4898_s22 = sshll.u32 %s4998_s7, 4  ;;  %s4899_s22 = int_to_ptr.vmem [resolvable:$false] %s4898_s22 }
  0x4c   : > { %v5274_v54 = vand.u32 4294901760, %v5256_v45  ;;  %v5277_v56 = vand.u32 4294901760, %v304_v46  ;;  %v1196_v57 = vand.u32 4294901760, %v1195_v47  ;;  %v5280_v59 = vsub.f32 %v218_v41, %v5267_v49  ;;  %s4900_s21 = scalar_lea.vmem %s4899_s22, 8192  ;;  %p4901_p11 = scmp.lt.s32.totalorder %s5868_s13, %s4899_s22 }
  0x4d   : > { %v1203_v58 = vand.u32 4294901760, %v1202_v48  ;;  %v5282_v60 = vand.u32 4294901760, %v314_v51  ;;  %v4436_v61 = vpack.c.bf16 %v393_v53, %v386_v52  ;;  %v221_v63 = vsel %vm207_vm0, %v199_v50, 0  ;;  %p4897_p0 = pneg %p4896_p12  ;;  %p4902_p13 = scmp.lt.s32.totalorder %s4900_s21, %s4894_s6 }
  0x4e   : > { %v324_v62 = vsub.f32 %v5256_v45, %v5274_v54  ;;  %3956 = vmatprep.mubr.f32.mxu0 %v5277_v56  ;;  %4076 = vmatprep.mubr.f32.mxu1 %v5277_v56  ;;  %v5291_v2 = vand.u32 4294901760, %v5280_v59  ;;  %v5293_v3 = vand.u32 4294901760, %v221_v63  ;;  %v224_v4 = vsel %vm207_vm0, %v200_v55, 0 }
  0x4f   : > { %v4484_v1 = vpack.c.bf16 %v1203_v58, %v1196_v57  ;;  %3957 = vmatmul.mubr.f32.vlgmr.msra.gmra.mrb[0].mxu0 %v5282_v60  ;;  %4437 = vmatprep.subr.bf16.mxu0 %v4436_v61  ;;  %v5299_v6 = vand.u32 4294901760, %v224_v4  ;;  %v5304_v9 = vsub.f32 %v5168_v7, %v239_v10  ;;  %v5309_v14 = vsub.f32 %v5173_v8, %v242_v11  ;;  %p4903_p1 = por %p4902_p13, %p4901_p11 }
  0x50   : > { %v5297_v5 = vand.u32 4294901760, %v324_v62  ;;  %4077 = vmatmul.mubr.f32.vlgmr.msra.gmra.mrb[0].mxu1 %v5282_v60  ;;  %v334_v18 = vsub.f32 %v5280_v59, %v5291_v2  ;;  %v5315_v19 = vsub.f32 %v221_v63, %v5293_v3  ;;  %v5320_v20 = vsub.f32 %v5180_v12, %v1049_v16  ;;  %4439 = vmatpush3.bf16.msra.mxu0 %v4436_v61 }
  0x51   : > { %4485 = vmatprep.subr.bf16.mxu1 %v4484_v1  ;;  %v227_v7 = vsel %vm207_vm0, %v201_v0, 0  ;;  %v5324_v8 = vsub.f32 %v224_v4, %v5299_v6  ;;  %v398_v10 = vand.u32 4294901760, %v5304_v9  ;;  %v405_v11 = vand.u32 4294901760, %v5309_v14  ;;  %p4904_p4 = pnand %p4903_p1, %p4897_p0 }
  0x52   : > { %4487 = vmatpush3.bf16.msra.mxu1 %v4484_v1  ;;  %v5331_v24 = vsub.f32 %v5185_v13, %v1052_v17  ;;  %3959 = vmatprep.mubr.f32.mxu0 %v5297_v5  ;;  %v5336_v12 = vand.u32 4294901760, %v334_v18  ;;  %v5339_v16 = vand.u32 4294901760, %v5315_v19  ;;  %v1208_v33 = vand.u32 4294901760, %v5320_v20 }
  0x53   : > { %4079 = vmatprep.mubr.f32.mxu1 %v5297_v5  ;;  %v5342_v41 = vand.u32 4294901760, %v227_v7  ;;  %v5345_v43 = vand.u32 4294901760, %v5324_v8  ;;  %v399_v13 = vsub.f32 %v5304_v9, %v398_v10  ;;  %v406_v17 = vsub.f32 %v5309_v14, %v405_v11 }
  0x54   : > { %v1215_v44 = vand.u32 4294901760, %v5331_v24  ;;  %3960 = vmatmul.mubr.f32.gmra.mrb[2].mxu0 %v5336_v12  ;;  %4080 = vmatmul.mubr.f32.gmra.mrb[2].mxu1 %v5336_v12  ;;  %v344_v46 = vsub.f32 %v5315_v19, %v5339_v16  ;;  %v1209_v47 = vsub.f32 %v5320_v20, %v1208_v33  ;;  %v230_v50 = vsel %vm207_vm0, %v202_v29, 0 }
  0x55   : > { %v5362_v48 = vsub.f32 %v227_v7, %v5342_v41  ;;  %v354_v51 = vsub.f32 %v5324_v8, %v5345_v43  ;;  %v400_v52 = vand.u32 4294901760, %v399_v13  ;;  %v407_v53 = vand.u32 4294901760, %v406_v17 }
  0x56   : > { %v1216_v55 = vsub.f32 %v5331_v24, %v1215_v44  ;;  %v5370_v57 = vand.u32 4294901760, %v344_v46  ;;  %v1210_v58 = vand.u32 4294901760, %v1209_v47  ;;  %v5375_v62 = vand.u32 4294901760, %v230_v50 }
  0x57   : > { %v5373_v61 = vand.u32 4294901760, %v5362_v48  ;;  %v5377_v63 = vand.u32 4294901760, %v354_v51  ;;  %v4440_v0 = vpack.c.bf16 %v407_v53, %v400_v52  ;;  %v4444_v4 = vpack.c.bf16 %v5217_v28, %v5215_v27 }
  0x58   : > { %v1217_v1 = vand.u32 4294901760, %v1216_v55  ;;  %3962 = vmatprep.mubr.f32.mxu0 %v5370_v57  ;;  %4082 = vmatprep.mubr.f32.mxu1 %v5370_v57  ;;  %v5386_v7 = vsub.f32 %v230_v50, %v5375_v62  ;;  %v4492_v13 = vpack.c.bf16 %v5227_v32, %v5225_v31  ;;  %v4448_v51 = vpack.c.bf16 %v5309_v14, %v5304_v9  ;;  %v3615_v31 = vld [vmem:[%s5939_s1 + $0x40] sm:$0xff]  ;;  %v3616_v32 = vld [vmem:[%s5939_s1 + $0x48] sm:$0xff] }
  0x59   : > { %v364_v18 = vsub.f32 %v5362_v48, %v5373_v61  ;;  %3963 = vmatmul.mubr.f32.gmra.mrb[4].mxu0 %v5377_v63  ;;  %4441 = vmatprep.subr.bf16.mxu0 %v4440_v0  ;;  %v4496_v52 = vpack.c.bf16 %v5331_v24, %v5320_v20  ;;  %v4460_v53 = vpack.c.bf16 %v391_v36, %v384_v35  ;;  %v3635_v35 = vld [vmem:[%s5939_s1 + $0x60] sm:$0xff]  ;;  %v3636_v36 = vld [vmem:[%s5939_s1 + $0x68] sm:$0xff] }
  0x5a   : > { %v4488_v29 = vpack.c.bf16 %v1217_v1, %v1210_v58  ;;  %4083 = vmatmul.mubr.f32.gmra.mrb[4].mxu1 %v5377_v63  ;;  %4443 = vmatpush3.bf16.msra.mxu0 %v4440_v0  ;;  %v5395_v46 = vand.u32 4294901760, %v5386_v7  ;;  %v4508_v55 = vpack.c.bf16 %v1201_v40, %v1194_v39  ;;  %v4464_v27 = vpack.c.bf16 %v405_v11, %v398_v10  ;;  %v3637_v58 = vld [vmem:[%s5939_s1 + $0x70] sm:$0xff]  ;;  %v3638_v0 = vld [vmem:[%s5939_s1 + $0x78] sm:$0xff] }
  0x5b   : > { %v5392_v17 = vand.u32 4294901760, %v364_v18  ;;  %4445 = vmatprep.subr.bf16.mxu0 %v4444_v4  ;;  %v4512_v28 = vpack.c.bf16 %v1215_v44, %v1208_v33  ;;  %v1852_v39 = vand.u32 4294901760, %v3615_v31  ;;  %v1855_v40 = vand.u32 4294901760, %v3616_v32  ;;  %v3618_v44 = vld [vmem:[%s5939_s1 + $0x58] sm:$0xff] }
  0x5c   : > { %4489 = vmatprep.subr.bf16.mxu1 %v4488_v29  ;;  %v374_v47 = vsub.f32 %v5386_v7, %v5395_v46  ;;  %v2661_v9 = vand.u32 4294901760, %v3635_v35  ;;  %v2664_v14 = vand.u32 4294901760, %v3636_v36 }
  0x5d   : > { %4491 = vmatpush3.bf16.msra.mxu1 %v4488_v29  ;;  %3965 = vmatprep.mubr.f32.mxu0 %v5392_v17  ;;  %v5503_v20 = vpack.c.bf16 %v1855_v40, %v1852_v39  ;;  %v5505_v10 = vsub.f32 %v3615_v31, %v1852_v39  ;;  %v5507_v11 = vsub.f32 %v3616_v32, %v1855_v40  ;;  %v1861_v29 = vand.u32 4294901760, %v3618_v44 }
  0x5e   : > { %4085 = vmatprep.mubr.f32.mxu1 %v5392_v17  ;;  %4493 = vmatprep.subr.bf16.mxu1 %v4492_v13  ;;  %v5401_v50 = vand.u32 4294901760, %v374_v47  ;;  %v5511_v24 = vpack.c.bf16 %v2664_v14, %v2661_v9  ;;  %v5513_v33 = vsub.f32 %v3635_v35, %v2661_v9  ;;  %v2670_v47 = vand.u32 4294901760, %v3638_v0 }
  0x5f   : > { %v5567_v32 = vsub.f32 %v3618_v44, %v1861_v29 }
  0x60   : > { %3966 = vmatmul.mubr.f32.gmra.mrb[6].mxu0 %v5401_v50  ;;  %4086 = vmatmul.mubr.f32.gmra.mrb[6].mxu1 %v5401_v50  ;;  %v2812_v1 = vand.u32 4294901760, %v5513_v33 }
  0x61   : > { %3976 = vmatprep.mubr.f32.mxu0 %v5203_v23  ;;  %4096 = vmatprep.mubr.f32.mxu1 %v5203_v23  ;;  %v2024_v44 = vand.u32 4294901760, %v5567_v32 }
  0x64   : > { %3977 = vmatmul.mubr.f32.vlgmr.msra.gmra.mrb[0].mxu0 %v5213_v26  ;;  %4097 = vmatmul.mubr.f32.vlgmr.msra.gmra.mrb[0].mxu1 %v5213_v26 }
  0x65   : > { %4447 = vmatpush3.bf16.msra.mxu0 %v4444_v4  ;;  %4495 = vmatpush3.bf16.msra.mxu1 %v4492_v13  ;;  %v2667_v13 = vand.u32 4294901760, %v3637_v58 }
  0x66   : > { %3979 = vmatprep.mubr.f32.mxu0 %v5237_v37  ;;  %4099 = vmatprep.mubr.f32.mxu1 %v5237_v37 }
  0x67   : > { %4449 = vmatprep.subr.bf16.mxu0 %v4448_v51  ;;  %4497 = vmatprep.subr.bf16.mxu1 %v4496_v52  ;;  %v5569_v35 = vsub.f32 %v3637_v58, %v2667_v13 }
  0x68   : > { %3980 = vmatmul.mubr.f32.gmra.mrb[2].mxu0 %v5267_v49  ;;  %4100 = vmatmul.mubr.f32.gmra.mrb[2].mxu1 %v5267_v49 }
  0x69   : > { %3982 = vmatprep.mubr.f32.mxu0 %v5293_v3  ;;  %4102 = vmatprep.mubr.f32.mxu1 %v5293_v3 }
  0x6a   : > { %4451 = vmatpush3.bf16.msra.mxu0 %v4448_v51  ;;  %4499 = vmatpush3.bf16.msra.mxu1 %v4496_v52 }
  0x6b   : > { %4453 = vmatprep.subr.bf16.mxu0 %v5188_v15  ;;  %4501 = vmatprep.subr.bf16.mxu1 %v5195_v21 }
  0x6c   : > { %3983 = vmatmul.mubr.f32.gmra.mrb[4].mxu0 %v5299_v6  ;;  %4103 = vmatmul.mubr.f32.gmra.mrb[4].mxu1 %v5299_v6 }
  0x6d   : > { %3985 = vmatprep.mubr.f32.mxu0 %v5342_v41  ;;  %4105 = vmatprep.mubr.f32.mxu1 %v5342_v41 }
  0x70   : > { %3986 = vmatmul.mubr.f32.gmra.mrb[6].mxu0 %v5375_v62  ;;  %4106 = vmatmul.mubr.f32.gmra.mrb[6].mxu1 %v5375_v62 }
  0x71   : > { %3996 = vmatprep.mubr.f32.mxu0 %v5223_v30  ;;  %4116 = vmatprep.mubr.f32.mxu1 %v5223_v30 }
  0x74   : > { %3997 = vmatmul.mubr.f32.vlgmr.msra.gmra.mrb[0].mxu0 %v5233_v34  ;;  %4117 = vmatmul.mubr.f32.vlgmr.msra.gmra.mrb[0].mxu1 %v5233_v34 }
  0x75   : > { %4455 = vmatpush3.bf16.msra.mxu0 %v5188_v15  ;;  %4503 = vmatpush3.bf16.msra.mxu1 %v5195_v21 }
  0x76   : > { %3999 = vmatprep.mubr.f32.mxu0 %v5256_v45  ;;  %4119 = vmatprep.mubr.f32.mxu1 %v5256_v45 }
  0x77   : > { %4457 = vmatprep.subr.bf16.mxu0 %v5201_v22  ;;  %4505 = vmatprep.subr.bf16.mxu1 %v5211_v25 }
  0x78   : > { %4000 = vmatmul.mubr.f32.gmra.mrb[2].mxu0 %v5280_v59  ;;  %4120 = vmatmul.mubr.f32.gmra.mrb[2].mxu1 %v5280_v59 }
  0x79   : > { %4002 = vmatprep.mubr.f32.mxu0 %v5315_v19  ;;  %4122 = vmatprep.mubr.f32.mxu1 %v5315_v19 }
  0x7a   : > { %4459 = vmatpush3.bf16.msra.mxu0 %v5201_v22  ;;  %4507 = vmatpush3.bf16.msra.mxu1 %v5211_v25 }
  0x7b   : > { %4461 = vmatprep.subr.bf16.mxu0 %v4460_v53  ;;  %4509 = vmatprep.subr.bf16.mxu1 %v4508_v55 }
  0x7c   : > { %4003 = vmatmul.mubr.f32.gmra.mrb[4].mxu0 %v5324_v8  ;;  %4123 = vmatmul.mubr.f32.gmra.mrb[4].mxu1 %v5324_v8 }
  0x7d   : > { %4005 = vmatprep.mubr.f32.mxu0 %v5362_v48  ;;  %4125 = vmatprep.mubr.f32.mxu1 %v5362_v48 }
  0x80   : > { %4006 = vmatmul.mubr.f32.gmra.mrb[6].mxu0 %v5386_v7  ;;  %4126 = vmatmul.mubr.f32.gmra.mrb[6].mxu1 %v5386_v7 }
  0x81   : > { %4016 = vmatprep.mubr.f32.mxu0 %v5241_v38  ;;  %4136 = vmatprep.mubr.f32.mxu1 %v5241_v38 }
  0x84   : > { %4017 = vmatmul.mubr.f32.vlgmr.msra.gmra.mrb[0].mxu0 %v5247_v42  ;;  %4137 = vmatmul.mubr.f32.vlgmr.msra.gmra.mrb[0].mxu1 %v5247_v42 }
  0x85   : > { %4463 = vmatpush3.bf16.msra.mxu0 %v4460_v53  ;;  %4511 = vmatpush3.bf16.msra.mxu1 %v4508_v55  ;;  %v2813_v53 = vsub.f32 %v5513_v33, %v2812_v1 }
  0x86   : > { %4019 = vmatprep.mubr.f32.mxu0 %v5274_v54  ;;  %4139 = vmatprep.mubr.f32.mxu1 %v5274_v54 }
  0x87   : > { %4465 = vmatprep.subr.bf16.mxu0 %v4464_v27  ;;  %4513 = vmatprep.subr.bf16.mxu1 %v4512_v28  ;;  %v2814_v9 = vand.u32 4294901760, %v2813_v53 }
  0x88   : > { %4020 = vmatmul.mubr.f32.gmra.mrb[2].mxu0 %v5291_v2  ;;  %4140 = vmatmul.mubr.f32.gmra.mrb[2].mxu1 %v5291_v2 }
  0x89   : > { %4022 = vmatprep.mubr.f32.mxu0 %v5339_v16  ;;  %4142 = vmatprep.mubr.f32.mxu1 %v5339_v16 }
  0x8a   : > { %4467 = vmatpush3.bf16.msra.mxu0 %v4464_v27  ;;  %4515 = vmatpush3.bf16.msra.mxu1 %v4512_v28  ;;  %v5563_v28 = vpack.c.bf16 %v2670_v47, %v2667_v13 }
  0x8b   : > { %4469 = vmatprep.subr.bf16.mxu0 %v5188_v15  ;;  %4517 = vmatprep.subr.bf16.mxu1 %v5195_v21 }
  0x8c   : > { %4023 = vmatmul.mubr.f32.gmra.mrb[4].mxu0 %v5345_v43  ;;  %4143 = vmatmul.mubr.f32.gmra.mrb[4].mxu1 %v5345_v43 }
  0x8d   : > { %4025 = vmatprep.mubr.f32.mxu0 %v5373_v61  ;;  %4145 = vmatprep.mubr.f32.mxu1 %v5373_v61 }
  0x90   : > { %4026 = vmatmul.mubr.f32.gmra.mrb[6].mxu0 %v5395_v46  ;;  %4146 = vmatmul.mubr.f32.gmra.mrb[6].mxu1 %v5395_v46 }
  0x91   : > { %4036 = vmatprep.mubr.f32.mxu0 %v5203_v23  ;;  %4156 = vmatprep.mubr.f32.mxu1 %v5203_v23 }
  0x94   : > { %4037 = vmatmul.mubr.f32.vlgmr.msra.gmra.mrb[0].mxu0 %v5213_v26  ;;  %4157 = vmatmul.mubr.f32.vlgmr.msra.gmra.mrb[0].mxu1 %v5213_v26 }
  0x95   : > { %4471 = vmatpush3.bf16.msra.mxu0 %v5188_v15  ;;  %4519 = vmatpush3.bf16.msra.mxu1 %v5195_v21  ;;  %v5515_v15 = vsub.f32 %v3636_v36, %v2664_v14  ;;  %v3617_v21 = vld [vmem:[%s5939_s1 + $0x50] sm:$0xff]  ;;  %v5571_v36 = vsub.f32 %v3638_v0, %v2670_v47  ;;  %v2025_v47 = vsub.f32 %v5567_v32, %v2024_v44 }
  0x96   : > { %4039 = vmatprep.mubr.f32.mxu0 %v5237_v37  ;;  %4159 = vmatprep.mubr.f32.mxu1 %v5237_v37  ;;  %v1858_v18 = vand.u32 4294901760, %v3617_v21 }
  0x97   : > { %4473 = vmatprep.subr.bf16.mxu0 %v5201_v22  ;;  %4521 = vmatprep.subr.bf16.mxu1 %v5211_v25  ;;  %v2819_v4 = vand.u32 4294901760, %v5515_v15 }
  0x98   : > { %4040 = vmatmul.mubr.f32.gmra.mrb[2].mxu0 %v5267_v49  ;;  %4160 = vmatmul.mubr.f32.gmra.mrb[2].mxu1 %v5267_v49  ;;  %v5561_v27 = vpack.c.bf16 %v1861_v29, %v1858_v18  ;;  %v5565_v31 = vsub.f32 %v3617_v21, %v1858_v18  ;;  %v2826_v18 = vand.u32 4294901760, %v5569_v35  ;;  %v2833_v29 = vand.u32 4294901760, %v5571_v36 }
  0x99   : > { %4042 = vmatprep.mubr.f32.mxu0 %v5293_v3  ;;  %4162 = vmatprep.mubr.f32.mxu1 %v5293_v3  ;;  %v2820_v55 = vsub.f32 %v5515_v15, %v2819_v4 }
  0x9a   : > { %4475 = vmatpush3.bf16.msra.mxu0 %v5201_v22  ;;  %4523 = vmatpush3.bf16.msra.mxu1 %v5211_v25  ;;  %v2003_v22 = vand.u32 4294901760, %v5505_v10  ;;  %v2010_v25 = vand.u32 4294901760, %v5507_v11  ;;  %v2017_v21 = vand.u32 4294901760, %v5565_v31 }
  0x9b   : > { %4525 = vmatprep.subr.bf16.mxu0 %v5503_v20  ;;  %4573 = vmatprep.subr.bf16.mxu1 %v5511_v24  ;;  %v2821_v14 = vand.u32 4294901760, %v2820_v55  ;;  %v2026_v55 = vand.u32 4294901760, %v2025_v47 }
  0x9c   : > { %4043 = vmatmul.mubr.f32.gmra.mrb[4].mxu0 %v5299_v6  ;;  %4163 = vmatmul.mubr.f32.gmra.mrb[4].mxu1 %v5299_v6  ;;  %v2004_v51 = vsub.f32 %v5505_v10, %v2003_v22  ;;  %v2011_v52 = vsub.f32 %v5507_v11, %v2010_v25  ;;  %v2018_v13 = vsub.f32 %v5565_v31, %v2017_v21 }
  0x9d   : > { %4045 = vmatprep.mubr.f32.mxu0 %v5342_v41  ;;  %4165 = vmatprep.mubr.f32.mxu1 %v5342_v41  ;;  %v4580_v0 = vpack.c.bf16 %v2821_v14, %v2814_v9 }
  0x9e   : > { %v2005_v39 = vand.u32 4294901760, %v2004_v51  ;;  %v2012_v40 = vand.u32 4294901760, %v2011_v52  ;;  %v2827_v51 = vsub.f32 %v5569_v35, %v2826_v18  ;;  %v2834_v52 = vsub.f32 %v5571_v36, %v2833_v29 }
  0x9f   : > { %v2019_v53 = vand.u32 4294901760, %v2018_v13  ;;  %v4540_v13 = vpack.c.bf16 %v5507_v11, %v5505_v10 }
  0xa0   : > { %4046 = vmatmul.mubr.f32.gmra.mrb[6].mxu0 %v5375_v62  ;;  %4166 = vmatmul.mubr.f32.gmra.mrb[6].mxu1 %v5375_v62  ;;  %v4532_v58 = vpack.c.bf16 %v2012_v40, %v2005_v39  ;;  %v2828_v39 = vand.u32 4294901760, %v2827_v51  ;;  %v2835_v40 = vand.u32 4294901760, %v2834_v52 }
  0xa1   : > { %4056 = vmatprep.mubr.f32.mxu0 %v5203_v23  ;;  %4176 = vmatprep.mubr.f32.mxu1 %v5203_v23  ;;  %v4536_v9 = vpack.c.bf16 %v2026_v55, %v2019_v53 }
  0xa2   : > { %v4584_v14 = vpack.c.bf16 %v2835_v40, %v2828_v39 }
  0xa4   : > { %4057 = vmatmul.mubr.f32.vlgmr.msra.gmra.mrb[0].mxu0 %v5213_v26  ;;  %4177 = vmatmul.mubr.f32.vlgmr.msra.gmra.mrb[0].mxu1 %v5213_v26 }
  0xa5   : > { %4527 = vmatpush3.bf16.msra.mxu0 %v5503_v20  ;;  %4575 = vmatpush3.bf16.msra.mxu1 %v5511_v24 }
  0xa6   : > { %4059 = vmatprep.mubr.f32.mxu0 %v5237_v37  ;;  %4179 = vmatprep.mubr.f32.mxu1 %v5237_v37 }
  0xa7   : > { %4529 = vmatprep.subr.bf16.mxu0 %v5561_v27  ;;  %4577 = vmatprep.subr.bf16.mxu1 %v5563_v28 }
  0xa8   : > { %4060 = vmatmul.mubr.f32.gmra.mrb[2].mxu0 %v5267_v49  ;;  %4180 = vmatmul.mubr.f32.gmra.mrb[2].mxu1 %v5267_v49 }
  0xa9   : > { %4062 = vmatprep.mubr.f32.mxu0 %v5293_v3  ;;  %4182 = vmatprep.mubr.f32.mxu1 %v5293_v3 }
  0xaa   : > { %4531 = vmatpush3.bf16.msra.mxu0 %v5561_v27  ;;  %4579 = vmatpush3.bf16.msra.mxu1 %v5563_v28 }
  0xab   : > { %4533 = vmatprep.subr.bf16.mxu0 %v4532_v58  ;;  %4581 = vmatprep.subr.bf16.mxu1 %v4580_v0 }
  0xac   : > { %4063 = vmatmul.mubr.f32.gmra.mrb[4].mxu0 %v5299_v6  ;;  %4183 = vmatmul.mubr.f32.gmra.mrb[4].mxu1 %v5299_v6 }
  0xad   : > { %4065 = vmatprep.mubr.f32.mxu0 %v5342_v41  ;;  %4185 = vmatprep.mubr.f32.mxu1 %v5342_v41 }
  0xb0   : > { %4066 = vmatmul.mubr.f32.gmra.mrb[6].mxu0 %v5375_v62  ;;  %4186 = vmatmul.mubr.f32.gmra.mrb[6].mxu1 %v5375_v62 }
  0xb1   : > { %4196 = vmatprep.mubr.f32.mxu0 %v5277_v56  ;;  %4316 = vmatprep.mubr.f32.mxu1 %v5277_v56  ;;  %v4588_v56 = vpack.c.bf16 %v5515_v15, %v5513_v33 }
  0xb4   : > { %4197 = vmatmul.mubr.f32.vlgmr.msra.gmra.mrb[8].mxu0 %v5282_v60  ;;  %4317 = vmatmul.mubr.f32.vlgmr.msra.gmra.mrb[8].mxu1 %v5282_v60  ;;  %v4544_v60 = vpack.c.bf16 %v5567_v32, %v5565_v31 }
  0xb5   : > { %4535 = vmatpush3.bf16.msra.mxu0 %v4532_v58  ;;  %4583 = vmatpush3.bf16.msra.mxu1 %v4580_v0 }
  0xb6   : > { %4199 = vmatprep.mubr.f32.mxu0 %v5297_v5  ;;  %4319 = vmatprep.mubr.f32.mxu1 %v5297_v5  ;;  %v4592_v5 = vpack.c.bf16 %v5571_v36, %v5569_v35 }
  0xb7   : > { %4537 = vmatprep.subr.bf16.mxu0 %v4536_v9  ;;  %4585 = vmatprep.subr.bf16.mxu1 %v4584_v14 }
  0xb8   : > { %4200 = vmatmul.mubr.f32.gmra.mrb[10].mxu0 %v5336_v12  ;;  %4320 = vmatmul.mubr.f32.gmra.mrb[10].mxu1 %v5336_v12 }
  0xb9   : > { %4202 = vmatprep.mubr.f32.mxu0 %v5370_v57  ;;  %4322 = vmatprep.mubr.f32.mxu1 %v5370_v57 }
  0xba   : > { %4539 = vmatpush3.bf16.msra.mxu0 %v4536_v9  ;;  %4587 = vmatpush3.bf16.msra.mxu1 %v4584_v14 }
  0xbb   : > { %4541 = vmatprep.subr.bf16.mxu0 %v4540_v13  ;;  %4589 = vmatprep.subr.bf16.mxu1 %v4588_v56 }
  0xbc   : > { %4203 = vmatmul.mubr.f32.gmra.mrb[12].mxu0 %v5377_v63  ;;  %4323 = vmatmul.mubr.f32.gmra.mrb[12].mxu1 %v5377_v63 }
  0xbd   : > { %4205 = vmatprep.mubr.f32.mxu0 %v5392_v17  ;;  %4325 = vmatprep.mubr.f32.mxu1 %v5392_v17 }
  0xc0   : > { %4206 = vmatmul.mubr.f32.gmra.mrb[14].mxu0 %v5401_v50  ;;  %4326 = vmatmul.mubr.f32.gmra.mrb[14].mxu1 %v5401_v50 }
  0xc1   : > { %4216 = vmatprep.mubr.f32.mxu0 %v5203_v23  ;;  %4336 = vmatprep.mubr.f32.mxu1 %v5203_v23 }
  0xc4   : > { %4217 = vmatmul.mubr.f32.vlgmr.msra.gmra.mrb[8].mxu0 %v5213_v26  ;;  %4337 = vmatmul.mubr.f32.vlgmr.msra.gmra.mrb[8].mxu1 %v5213_v26 }
  0xc5   : > { %4543 = vmatpush3.bf16.msra.mxu0 %v4540_v13  ;;  %4591 = vmatpush3.bf16.msra.mxu1 %v4588_v56 }
  0xc6   : > { %4219 = vmatprep.mubr.f32.mxu0 %v5237_v37  ;;  %4339 = vmatprep.mubr.f32.mxu1 %v5237_v37 }
  0xc7   : > { %4545 = vmatprep.subr.bf16.mxu0 %v4544_v60  ;;  %4593 = vmatprep.subr.bf16.mxu1 %v4592_v5 }
  0xc8   : > { %4220 = vmatmul.mubr.f32.gmra.mrb[10].mxu0 %v5267_v49  ;;  %4340 = vmatmul.mubr.f32.gmra.mrb[10].mxu1 %v5267_v49 }
  0xc9   : > { %4222 = vmatprep.mubr.f32.mxu0 %v5293_v3  ;;  %4342 = vmatprep.mubr.f32.mxu1 %v5293_v3 }
  0xca   : > { %4547 = vmatpush3.bf16.msra.mxu0 %v4544_v60  ;;  %4595 = vmatpush3.bf16.msra.mxu1 %v4592_v5 }
  0xcb   : > { %4549 = vmatprep.subr.bf16.mxu0 %v5503_v20  ;;  %4597 = vmatprep.subr.bf16.mxu1 %v5511_v24 }
  0xcc   : > { %4223 = vmatmul.mubr.f32.gmra.mrb[12].mxu0 %v5299_v6  ;;  %4343 = vmatmul.mubr.f32.gmra.mrb[12].mxu1 %v5299_v6 }
  0xcd   : > { %4225 = vmatprep.mubr.f32.mxu0 %v5342_v41  ;;  %4345 = vmatprep.mubr.f32.mxu1 %v5342_v41 }
  0xd0   : > { %4226 = vmatmul.mubr.f32.gmra.mrb[14].mxu0 %v5375_v62  ;;  %4346 = vmatmul.mubr.f32.gmra.mrb[14].mxu1 %v5375_v62 }
  0xd1   : > { %4236 = vmatprep.mubr.f32.mxu0 %v5223_v30  ;;  %4356 = vmatprep.mubr.f32.mxu1 %v5223_v30  ;;  %v4556_v30 = vpack.c.bf16 %v2010_v25, %v2003_v22 }
  0xd4   : > { %4237 = vmatmul.mubr.f32.vlgmr.msra.gmra.mrb[8].mxu0 %v5233_v34  ;;  %4357 = vmatmul.mubr.f32.vlgmr.msra.gmra.mrb[8].mxu1 %v5233_v34  ;;  %v4604_v34 = vpack.c.bf16 %v2819_v4, %v2812_v1 }
  0xd5   : > { %4551 = vmatpush3.bf16.msra.mxu0 %v5503_v20  ;;  %4599 = vmatpush3.bf16.msra.mxu1 %v5511_v24 }
  0xd6   : > { %4239 = vmatprep.mubr.f32.mxu0 %v5256_v45  ;;  %4359 = vmatprep.mubr.f32.mxu1 %v5256_v45  ;;  %v4560_v45 = vpack.c.bf16 %v2024_v44, %v2017_v21 }
  0xd7   : > { %4553 = vmatprep.subr.bf16.mxu0 %v5561_v27  ;;  %4601 = vmatprep.subr.bf16.mxu1 %v5563_v28 }
  0xd8   : > { %4240 = vmatmul.mubr.f32.gmra.mrb[10].mxu0 %v5280_v59  ;;  %4360 = vmatmul.mubr.f32.gmra.mrb[10].mxu1 %v5280_v59  ;;  %v4608_v59 = vpack.c.bf16 %v2833_v29, %v2826_v18 }
  0xd9   : > { %4242 = vmatprep.mubr.f32.mxu0 %v5315_v19  ;;  %4362 = vmatprep.mubr.f32.mxu1 %v5315_v19 }
  0xda   : > { %4555 = vmatpush3.bf16.msra.mxu0 %v5561_v27  ;;  %4603 = vmatpush3.bf16.msra.mxu1 %v5563_v28 }
  0xdb   : > { %4557 = vmatprep.subr.bf16.mxu0 %v4556_v30  ;;  %4605 = vmatprep.subr.bf16.mxu1 %v4604_v34 }
  0xdc   : > { %4243 = vmatmul.mubr.f32.gmra.mrb[12].mxu0 %v5324_v8  ;;  %4363 = vmatmul.mubr.f32.gmra.mrb[12].mxu1 %v5324_v8 }
  0xdd   : > { %4245 = vmatprep.mubr.f32.mxu0 %v5362_v48  ;;  %4365 = vmatprep.mubr.f32.mxu1 %v5362_v48 }
  0xe0   : > { %4246 = vmatmul.mubr.f32.gmra.mrb[14].mxu0 %v5386_v7  ;;  %4366 = vmatmul.mubr.f32.gmra.mrb[14].mxu1 %v5386_v7 }
  0xe1   : > { %4256 = vmatprep.mubr.f32.mxu0 %v5241_v38  ;;  %4376 = vmatprep.mubr.f32.mxu1 %v5241_v38 }
  0xe4   : > { %4257 = vmatmul.mubr.f32.vlgmr.msra.gmra.mrb[8].mxu0 %v5247_v42  ;;  %4377 = vmatmul.mubr.f32.vlgmr.msra.gmra.mrb[8].mxu1 %v5247_v42 }
  0xe5   : > { %4559 = vmatpush3.bf16.msra.mxu0 %v4556_v30  ;;  %4607 = vmatpush3.bf16.msra.mxu1 %v4604_v34 }
  0xe6   : > { %4259 = vmatprep.mubr.f32.mxu0 %v5274_v54  ;;  %4379 = vmatprep.mubr.f32.mxu1 %v5274_v54 }
  0xe7   : > { %4561 = vmatprep.subr.bf16.mxu0 %v4560_v45  ;;  %4609 = vmatprep.subr.bf16.mxu1 %v4608_v59 }
  0xe8   : > { %4260 = vmatmul.mubr.f32.gmra.mrb[10].mxu0 %v5291_v2  ;;  %4380 = vmatmul.mubr.f32.gmra.mrb[10].mxu1 %v5291_v2 }
  0xe9   : > { %4262 = vmatprep.mubr.f32.mxu0 %v5339_v16  ;;  %4382 = vmatprep.mubr.f32.mxu1 %v5339_v16 }
  0xea   : > { %4563 = vmatpush3.bf16.msra.mxu0 %v4560_v45  ;;  %4611 = vmatpush3.bf16.msra.mxu1 %v4608_v59 }
  0xeb   : > { %4565 = vmatprep.subr.bf16.mxu0 %v5503_v20  ;;  %4613 = vmatprep.subr.bf16.mxu1 %v5511_v24 }
  0xec   : > { %4263 = vmatmul.mubr.f32.gmra.mrb[12].mxu0 %v5345_v43  ;;  %4383 = vmatmul.mubr.f32.gmra.mrb[12].mxu1 %v5345_v43 }
  0xed   : > { %4265 = vmatprep.mubr.f32.mxu0 %v5373_v61  ;;  %4385 = vmatprep.mubr.f32.mxu1 %v5373_v61 }
  0xf0   : > { %4266 = vmatmul.mubr.f32.gmra.mrb[14].mxu0 %v5395_v46  ;;  %4386 = vmatmul.mubr.f32.gmra.mrb[14].mxu1 %v5395_v46 }
  0xf1   : > { %4276 = vmatprep.mubr.f32.mxu0 %v5203_v23  ;;  %4396 = vmatprep.mubr.f32.mxu1 %v5203_v23 }
  0xf4   : > { %4277 = vmatmul.mubr.f32.vlgmr.msra.gmra.mrb[8].mxu0 %v5213_v26  ;;  %4397 = vmatmul.mubr.f32.vlgmr.msra.gmra.mrb[8].mxu1 %v5213_v26 }
  0xf5   : > { %4567 = vmatpush3.bf16.msra.mxu0 %v5503_v20  ;;  %4615 = vmatpush3.bf16.msra.mxu1 %v5511_v24 }
  0xf6   : > { %4279 = vmatprep.mubr.f32.mxu0 %v5237_v37  ;;  %4399 = vmatprep.mubr.f32.mxu1 %v5237_v37 }
  0xf7   : > { %4569 = vmatprep.subr.bf16.mxu0 %v5561_v27  ;;  %4617 = vmatprep.subr.bf16.mxu1 %v5563_v28 }
  0xf8   : > { %4280 = vmatmul.mubr.f32.gmra.mrb[10].mxu0 %v5267_v49  ;;  %4400 = vmatmul.mubr.f32.gmra.mrb[10].mxu1 %v5267_v49 }
  0xf9   : > { %4282 = vmatprep.mubr.f32.mxu0 %v5293_v3  ;;  %4402 = vmatprep.mubr.f32.mxu1 %v5293_v3 }
  0xfa   : > { %4571 = vmatpush3.bf16.msra.mxu0 %v5561_v27  ;;  %4619 = vmatpush3.bf16.msra.mxu1 %v5563_v28 }
  0xfc   : > { %4283 = vmatmul.mubr.f32.gmra.mrb[12].mxu0 %v5299_v6  ;;  %4403 = vmatmul.mubr.f32.gmra.mrb[12].mxu1 %v5299_v6 }
  0xfd   : > { %4285 = vmatprep.mubr.f32.mxu0 %v5342_v41  ;;  %4405 = vmatprep.mubr.f32.mxu1 %v5342_v41 }
 0x100   : > { %4286 = vmatmul.mubr.f32.gmra.mrb[14].mxu0 %v5375_v62  ;;  %4406 = vmatmul.mubr.f32.gmra.mrb[14].mxu1 %v5375_v62 }
 0x101   : > { %4296 = vmatprep.mubr.f32.mxu0 %v5203_v23  ;;  %4416 = vmatprep.mubr.f32.mxu1 %v5203_v23 }
 0x104   : > { %4297 = vmatmul.mubr.f32.vlgmr.msra.gmra.mrb[8].mxu0 %v5213_v26  ;;  %4417 = vmatmul.mubr.f32.vlgmr.msra.gmra.mrb[8].mxu1 %v5213_v26 }
 0x105   : > { %4299 = vmatprep.mubr.f32.mxu0 %v5237_v37  ;;  %4419 = vmatprep.mubr.f32.mxu1 %v5237_v37 }
 0x108   : > { %4300 = vmatmul.mubr.f32.gmra.mrb[10].mxu0 %v5267_v49  ;;  %4420 = vmatmul.mubr.f32.gmra.mrb[10].mxu1 %v5267_v49 }
 0x109   : > { %4302 = vmatprep.mubr.f32.mxu0 %v5293_v3  ;;  %4422 = vmatprep.mubr.f32.mxu1 %v5293_v3 }
 0x10c   : > { %4303 = vmatmul.mubr.f32.gmra.mrb[12].mxu0 %v5299_v6  ;;  %4423 = vmatmul.mubr.f32.gmra.mrb[12].mxu1 %v5299_v6 }
 0x10d   : > { %4305 = vmatprep.mubr.f32.mxu0 %v5342_v41  ;;  %4425 = vmatprep.mubr.f32.mxu1 %v5342_v41 }
 0x110   : > { %4306 = vmatmul.mubr.f32.gmra.mrb[14].mxu0 %v5375_v62  ;;  %4426 = vmatmul.mubr.f32.gmra.mrb[14].mxu1 %v5375_v62 }
 0x177   : > { %v4058_v23 = vpop.f32.mrb[0].mxu0  ;;  %v4178_v26 = vpop.f32.mrb[0].mxu1 }
 0x178   : > { %1020 = vst.msk [vmem:[%s5746_s17 + $0x4] sm:$0xf] %vm1018_vm1, %v4058_v23  ;;  %3600 = vst.msk [vmem:[%s5746_s17 + $0x24] sm:$0xf] %vm1018_vm1, %v4178_v26  ;;  %v972_v37 = vpop.f32.mrb[1].mxu0  ;;  %v1782_v38 = vpop.f32.mrb[1].mxu1 }
 0x179   : > { %3588 = vst.msk [vmem:[%s5746_s17 + $0x80] sm:$0xf0] %vm1028_vm2, %v4058_v23  ;;  %3608 = vst.msk [vmem:[%s5746_s17 + $0xa0] sm:$0xf0] %vm1028_vm2, %v4178_v26 }
 0x17a   : > { %1019 = vst.msk [vmem:[%s5746_s17] sm:$0xf] %vm1018_vm1, %v972_v37  ;;  %3599 = vst.msk [vmem:[%s5746_s17 + $0x20] sm:$0xf] %vm1018_vm1, %v1782_v38 }
 0x17b   : > { %3587 = vst.msk [vmem:[%s5746_s17 + $0x7c] sm:$0xf0] %vm1028_vm2, %v972_v37  ;;  %3607 = vst.msk [vmem:[%s5746_s17 + $0x9c] sm:$0xf0] %vm1028_vm2, %v1782_v38  ;;  %v4061_v42 = vpop.f32.mrb[2].mxu0  ;;  %v4181_v49 = vpop.f32.mrb[2].mxu1 }
 0x17c   : > { %1022 = vst.msk [vmem:[%s5746_s17 + $0xc] sm:$0xf] %vm1018_vm1, %v4061_v42  ;;  %3602 = vst.msk [vmem:[%s5746_s17 + $0x2c] sm:$0xf] %vm1018_vm1, %v4181_v49  ;;  %v984_v54 = vpop.f32.mrb[3].mxu0  ;;  %v1794_v2 = vpop.f32.mrb[3].mxu1 }
 0x17d   : > { %3590 = vst.msk [vmem:[%s5746_s17 + $0x88] sm:$0xf0] %vm1028_vm2, %v4061_v42  ;;  %3610 = vst.msk [vmem:[%s5746_s17 + $0xa8] sm:$0xf0] %vm1028_vm2, %v4181_v49 }
 0x17e   : > { %1021 = vst.msk [vmem:[%s5746_s17 + $0x8] sm:$0xf] %vm1018_vm1, %v984_v54  ;;  %3601 = vst.msk [vmem:[%s5746_s17 + $0x28] sm:$0xf] %vm1018_vm1, %v1794_v2 }
 0x17f   : > { %3589 = vst.msk [vmem:[%s5746_s17 + $0x84] sm:$0xf0] %vm1028_vm2, %v984_v54  ;;  %3609 = vst.msk [vmem:[%s5746_s17 + $0xa4] sm:$0xf0] %vm1028_vm2, %v1794_v2  ;;  %v4064_v3 = vpop.f32.mrb[4].mxu0  ;;  %v4184_v6 = vpop.f32.mrb[4].mxu1 }
 0x180   : > { %1024 = vst.msk [vmem:[%s5746_s17 + $0x14] sm:$0xf] %vm1018_vm1, %v4064_v3  ;;  %3604 = vst.msk [vmem:[%s5746_s17 + $0x34] sm:$0xf] %vm1018_vm1, %v4184_v6  ;;  %v996_v19 = vpop.f32.mrb[5].mxu0  ;;  %v1806_v8 = vpop.f32.mrb[5].mxu1 }
 0x181   : > { %3592 = vst.msk [vmem:[%s5746_s17 + $0x90] sm:$0xf0] %vm1028_vm2, %v4064_v3  ;;  %3612 = vst.msk [vmem:[%s5746_s17 + $0xb0] sm:$0xf0] %vm1028_vm2, %v4184_v6 }
 0x182   : > { %1023 = vst.msk [vmem:[%s5746_s17 + $0x10] sm:$0xf] %vm1018_vm1, %v996_v19  ;;  %3603 = vst.msk [vmem:[%s5746_s17 + $0x30] sm:$0xf] %vm1018_vm1, %v1806_v8 }
 0x183   : > { %3591 = vst.msk [vmem:[%s5746_s17 + $0x8c] sm:$0xf0] %vm1028_vm2, %v996_v19  ;;  %3611 = vst.msk [vmem:[%s5746_s17 + $0xac] sm:$0xf0] %vm1028_vm2, %v1806_v8  ;;  %v4067_v12 = vpop.f32.mrb[6].mxu0  ;;  %v4187_v16 = vpop.f32.mrb[6].mxu1 }
 0x184   : > { %1026 = vst.msk [vmem:[%s5746_s17 + $0x1c] sm:$0xf] %vm1018_vm1, %v4067_v12  ;;  %3606 = vst.msk [vmem:[%s5746_s17 + $0x3c] sm:$0xf] %vm1018_vm1, %v4187_v16  ;;  %v1008_v41 = vpop.f32.mrb[7].mxu0  ;;  %v1818_v43 = vpop.f32.mrb[7].mxu1 }
 0x185   : > { %3594 = vst.msk [vmem:[%s5746_s17 + $0x98] sm:$0xf0] %vm1028_vm2, %v4067_v12  ;;  %3614 = vst.msk [vmem:[%s5746_s17 + $0xb8] sm:$0xf0] %vm1028_vm2, %v4187_v16 }
 0x186   : > { %1025 = vst.msk [vmem:[%s5746_s17 + $0x18] sm:$0xf] %vm1018_vm1, %v1008_v41  ;;  %3605 = vst.msk [vmem:[%s5746_s17 + $0x38] sm:$0xf] %vm1018_vm1, %v1818_v43 }
 0x187   : > { %3593 = vst.msk [vmem:[%s5746_s17 + $0x94] sm:$0xf0] %vm1028_vm2, %v1008_v41  ;;  %3613 = vst.msk [vmem:[%s5746_s17 + $0xb4] sm:$0xf0] %vm1028_vm2, %v1818_v43 }
 0x1d7   : > { %v4298_v48 = vpop.f32.mrb[8].mxu0  ;;  %v4418_v57 = vpop.f32.mrb[8].mxu1 }
 0x1d8   : > { %3620 = vst.msk [vmem:[%s5746_s17 + $0x44] sm:$0xf] %vm1018_vm1, %v4298_v48  ;;  %3640 = vst.msk [vmem:[%s5746_s17 + $0x64] sm:$0xf] %vm1018_vm1, %v4418_v57  ;;  %v2591_v61 = vpop.f32.mrb[9].mxu0  ;;  %v3400_v62 = vpop.f32.mrb[9].mxu1 }
 0x1d9   : > { %3628 = vst.msk [vmem:[%s5746_s17 + $0xc0] sm:$0xf0] %vm1028_vm2, %v4298_v48  ;;  %3648 = vst.msk [vmem:[%s5746_s17 + $0xe0] sm:$0xf0] %vm1028_vm2, %v4418_v57 }
 0x1da   : > { %3619 = vst.msk [vmem:[%s5746_s17 + $0x40] sm:$0xf] %vm1018_vm1, %v2591_v61  ;;  %3639 = vst.msk [vmem:[%s5746_s17 + $0x60] sm:$0xf] %vm1018_vm1, %v3400_v62 }
 0x1db   : > { %3627 = vst.msk [vmem:[%s5746_s17 + $0xbc] sm:$0xf0] %vm1028_vm2, %v2591_v61  ;;  %3647 = vst.msk [vmem:[%s5746_s17 + $0xdc] sm:$0xf0] %vm1028_vm2, %v3400_v62  ;;  %v4301_v63 = vpop.f32.mrb[10].mxu0  ;;  %v4421_v7 = vpop.f32.mrb[10].mxu1 }
 0x1dc   : > { %3622 = vst.msk [vmem:[%s5746_s17 + $0x4c] sm:$0xf] %vm1018_vm1, %v4301_v63  ;;  %3642 = vst.msk [vmem:[%s5746_s17 + $0x6c] sm:$0xf] %vm1018_vm1, %v4421_v7  ;;  %v2603_v17 = vpop.f32.mrb[11].mxu0  ;;  %v3412_v46 = vpop.f32.mrb[11].mxu1 }
 0x1dd   : > { %3630 = vst.msk [vmem:[%s5746_s17 + $0xc8] sm:$0xf0] %vm1028_vm2, %v4301_v63  ;;  %3650 = vst.msk [vmem:[%s5746_s17 + $0xe8] sm:$0xf0] %vm1028_vm2, %v4421_v7 }
 0x1de   : > { %3621 = vst.msk [vmem:[%s5746_s17 + $0x48] sm:$0xf] %vm1018_vm1, %v2603_v17  ;;  %3641 = vst.msk [vmem:[%s5746_s17 + $0x68] sm:$0xf] %vm1018_vm1, %v3412_v46 }
 0x1df   : > { %3629 = vst.msk [vmem:[%s5746_s17 + $0xc4] sm:$0xf0] %vm1028_vm2, %v2603_v17  ;;  %3649 = vst.msk [vmem:[%s5746_s17 + $0xe4] sm:$0xf0] %vm1028_vm2, %v3412_v46  ;;  %v4304_v50 = vpop.f32.mrb[12].mxu0  ;;  %v4424_v20 = vpop.f32.mrb[12].mxu1 }
 0x1e0   : > { %3624 = vst.msk [vmem:[%s5746_s17 + $0x54] sm:$0xf] %vm1018_vm1, %v4304_v50  ;;  %3644 = vst.msk [vmem:[%s5746_s17 + $0x74] sm:$0xf] %vm1018_vm1, %v4424_v20  ;;  %v2615_v10 = vpop.f32.mrb[13].mxu0  ;;  %v3424_v11 = vpop.f32.mrb[13].mxu1 }
 0x1e1   : > { %3632 = vst.msk [vmem:[%s5746_s17 + $0xd0] sm:$0xf0] %vm1028_vm2, %v4304_v50  ;;  %3652 = vst.msk [vmem:[%s5746_s17 + $0xf0] sm:$0xf0] %vm1028_vm2, %v4424_v20 }
 0x1e2   : > { %3623 = vst.msk [vmem:[%s5746_s17 + $0x50] sm:$0xf] %vm1018_vm1, %v2615_v10  ;;  %3643 = vst.msk [vmem:[%s5746_s17 + $0x70] sm:$0xf] %vm1018_vm1, %v3424_v11 }
 0x1e3   : > { %3631 = vst.msk [vmem:[%s5746_s17 + $0xcc] sm:$0xf0] %vm1028_vm2, %v2615_v10  ;;  %3651 = vst.msk [vmem:[%s5746_s17 + $0xec] sm:$0xf0] %vm1028_vm2, %v3424_v11  ;;  %v4307_v24 = vpop.f32.mrb[14].mxu0  ;;  %v4427_v33 = vpop.f32.mrb[14].mxu1 }
 0x1e4   : > { %3626 = vst.msk [vmem:[%s5746_s17 + $0x5c] sm:$0xf] %vm1018_vm1, %v4307_v24  ;;  %3646 = vst.msk [vmem:[%s5746_s17 + $0x7c] sm:$0xf] %vm1018_vm1, %v4427_v33  ;;  %v2627_v15 = vpop.f32.mrb[15].mxu0  ;;  %v3436_v22 = vpop.f32.mrb[15].mxu1 }
 0x1e5   : > { %3634 = vst.msk [vmem:[%s5746_s17 + $0xd8] sm:$0xf0] %vm1028_vm2, %v4307_v24  ;;  %3654 = vst.msk [vmem:[%s5746_s17 + $0xf8] sm:$0xf0] %vm1028_vm2, %v4427_v33 }
 0x1e6   : > { %3625 = vst.msk [vmem:[%s5746_s17 + $0x58] sm:$0xf] %vm1018_vm1, %v2627_v15  ;;  %3645 = vst.msk [vmem:[%s5746_s17 + $0x78] sm:$0xf] %vm1018_vm1, %v3436_v22 }
 0x1e7   : > { %3633 = vst.msk [vmem:[%s5746_s17 + $0xd4] sm:$0xf0] %vm1028_vm2, %v2627_v15  ;;  %3653 = vst.msk [vmem:[%s5746_s17 + $0xf4] sm:$0xf0] %vm1028_vm2, %v3436_v22 }
 0x1e8   : > { %4907 = shalt.err (!%p4904_p4)
}
 0x1e9   : > { %s4908_s29 = scalar_lea.hbm %s5866_s3, 4096  ;;  %s4912_s17 = scalar_lea.hbm %s5940_s2, 16384 }
 0x1ea   : > { %p4909_p3 = scmp.ne.s32.totalorder %s5866_s3, %s4908_s29  ;;  %p4913_p2 = scmp.lt.u32.totalorder %s5866_s3, %s5940_s2 }
 0x1eb   : > { %p4914_p5 = scmp.lt.u32.totalorder %s4912_s17, %s4908_s29  ;;  %p4916_p8 = scmp.lt.u32.totalorder %s4908_s29, %s5866_s3 }
 0x1ec   : > { %p4910_p6 = pnand %p4909_p3, %p5947_p9 }
 0x1ed   : > { %p4915_p10 = por %p4914_p5, %p4913_p2 }
 0x1ee   : > { %p4911_p7 = pneg %p4910_p6 }
 0x1ef   : > { %p4917_p12 = por %p4916_p8, %p4915_p10 }
 0x1f1   : > { %p4918_p0 = pnand %p4917_p12, %p4911_p7 }
 0x1f3   : > { %4921 = shalt.err (!%p4918_p0)
}
 0x1f4   : > { %s4999_s12 = smov 64   ;;  %s5000_s27 = smov 128  }
 0x1f5   : > { %s5001_s23 = smov 4  }
 0x1f6   : > { %4782 = dma.vmem_to_hbm [thread:$0]  (%p5947_p9), %s5868_s13, 4096, %s5866_s3, %s3465_s5, %s4999_s12, %s5000_s27, %s5001_s23  }
 0x1f7 PF: > { %p4793_p11 = scmp.ge.s32.totalorder %s4992_s16, 2  ;;  %s3497_s6 = sand.u32 1, %s4964_s9  }
 0x1f8   : > { %p5948_p13 = scmp.ne.s32.totalorder %s5945_s28, 0  ;;  %s3498_s7 = scalar_lea.sflag [#allocation4], %s3497_s6 }
 0x1fa   : > { %p4789_p1 = pnand %p4793_p11, %p5948_p13 }
 0x1fc   : > { %4959 = dma.done.wait (!%p4789_p1), %s3498_s7, 4096  }
 0x1fd   : > { %4961 = vsyncadd (!%p4789_p1), %s3498_s7, 4294963200  ;;  %s18_s16 = sadd.s32 1, %s4992_s16   ;;  %s5949_s9 = smov %s4968_s10 }
 0x1fe   : > { %p15_p4 = scmp.ge.s32.totalorder %s18_s16, 6   ;;  %s5950_s10 = smov %s4972_s11 }
 0x1ff   : > { %s5951_s11 = smov %s5095_s30  ;;  %s5952_s12 = smov %s4984_s14 }
 0x200   : > { %s5953_s13 = smov %s4988_s15  ;;  %s5954_s14 = smov %s5957_s19 }
 0x201   : > { %s5955_s15 = smov %s5961_s20  ;;  %17 = sbr.rel (!%p15_p4) target bundleno = 7 (0x7), region = 83 }
 0x208   :  { %3503 = vsyncpa [#allocation3], 1 }
 0x209   :  { %3505 = vsyncpa [#allocation3 + $0x1], 1 }
 0x20a   :  { %3506 = vsyncpa [#allocation4], 1 }
 0x20b   :  { %3508 = vsyncpa [#allocation4 + $0x1], 1 }

</bundles_post_ra>
